<compile_context>
chip_gen: v5e
topology: v5e:2x2
jax: 0.10.0
libtpu: 0.0.40
codegen_flags: <defaults>
</compile_context>

<pallas_src>
import functools

import jax
import jax.numpy as jnp
from jax.experimental import pallas as pl
from jax.experimental.pallas import tpu as pltpu


def _round_up(x, m):
    return (x + m - 1) // m * m


def _celoss_kernel(lbl_ref, x_ref, w_ref, o_ref, *, inv_temperature, slope,
                   bias, batch, block_b):
    i = pl.program_id(0)

    x = x_ref[...].astype(jnp.float32)        # (TB, Cp) logits
    w = w_ref[...].astype(jnp.float32)        # (1, Cp)  class weights (row)
    lbl = lbl_ref[...]                        # (TB, 1)  int32 labels
    tb, cp = x.shape

    # ---- log_softmax(x / temperature, axis=-1) ----
    z = x * jnp.float32(inv_temperature)
    m = jnp.max(z, axis=-1, keepdims=True)
    e = jnp.exp(z - m)
    lse = jnp.log(jnp.sum(e, axis=-1, keepdims=True)) + m
    logp = z - lse                            # (TB, Cp)

    # ---- weighted terms (kept on VPU/XLU; no MXU) ----
    wlogp = logp * w                                              # (TB, Cp)
    row_sum = jnp.sum(wlogp, axis=-1, keepdims=True)              # (TB, 1)
    col = jax.lax.broadcasted_iota(jnp.int32, (tb, cp), 1)
    picked = jnp.sum(jnp.where(col == lbl, wlogp, 0.0),
                     axis=-1, keepdims=True)                      # (TB, 1)

    # smoothed target t = slope*onehot + bias  =>  loss_row = -(slope*picked + bias*row_sum)
    per_row = -(jnp.float32(slope) * picked + jnp.float32(bias) * row_sum)

    # zero out padded rows so any reduction over the raw output stays exact
    rows = i * block_b + jax.lax.broadcasted_iota(jnp.int32, (tb, 1), 0)
    per_row = jnp.where(rows < batch, per_row, 0.0)

    o_ref[...] = per_row


def ce_loss(logits, target, class_weights, *, temperature=1.0,
            label_smoothing=0.05, keep_sum=True, reduction='sum',
            n_classes=None, block_b=None):
    """Pallas implementation of CELoss.forward (single-label path)."""
    B, C = logits.shape
    if n_classes is None:
        n_classes = C

    if target.ndim >= logits.ndim:
        # TODO(synk): multilabel binarized targets need a dense-target path;
        # here we recover the single label per row.
        target = jnp.argmax(target, axis=-1)
    labels = target.astype(jnp.int32).reshape(B, 1)

    # ---- tiling: lane-dense class axis, batch tile sized for VMEM ----
    cp = _round_up(max(C, 128), 128)
    itemsize = jnp.dtype(logits.dtype).itemsize
    if block_b is None:
        # keep the per-block logits buffer (+ f32 temporaries) well under the
        # scoped-VMEM default on every generation (incl. v7x 64 MiB physical)
        tb = (2 * 1024 * 1024) // (cp * max(itemsize, 4))
        block_b = max(8, min(512, (tb // 8) * 8))
    bp = _round_up(B, block_b)

    # pad only when needed (aligned production shapes take the zero-copy path)
    if (bp, cp) != (B, C):
        logits = jnp.pad(logits, ((0, bp - B), (0, cp - C)),
                         constant_values=-1e30)   # exp() underflows -> no softmax effect
    if bp != B:
        labels = jnp.pad(labels, ((0, bp - B), (0, 0)))

    w_row = class_weights.reshape(1, C).astype(jnp.float32)        # (C,1)->(1,C)
    if cp != C:
        w_row = jnp.pad(w_row, ((0, 0), (0, cp - C)))              # padded classes weigh 0

    # label smoothing constants; for a one-hot target sum(target)==1 per row,
    # so keep_sum=True (bias = 1*ls/(C-1)) and keep_sum=False (bias = ls/(C-1))
    # coincide.  Uses the GLOBAL class count, not the padded block width.
    if label_smoothing > 0.0:
        bias = float(label_smoothing) / (float(n_classes) - 1.0)
        slope = 1.0 - float(label_smoothing) - bias
    else:
        bias, slope = 0.0, 1.0
    del keep_sum  # identical to keep_sum=False for single-label targets

    nblocks = bp // block_b
    kernel = functools.partial(
        _celoss_kernel,
        inv_temperature=1.0 / float(temperature),
        slope=slope, bias=bias, batch=B, block_b=block_b)

    cost = pl.CostEstimate(
        flops=6 * bp * cp,
        transcendentals=bp * cp,
        bytes_accessed=bp * cp * itemsize + bp * 4 + cp * 4 + bp * 4,
    )

    out = pl.pallas_call(
        kernel,
        out_shape=jax.ShapeDtypeStruct((bp, 1), jnp.float32),
        grid_spec=pltpu.PrefetchScalarGridSpec(
            num_scalar_prefetch=0,
            grid=(nblocks,),
            in_specs=[
                pl.BlockSpec((block_b, 1), lambda i: (i, 0)),    # labels
                pl.BlockSpec((block_b, cp), lambda i: (i, 0)),   # logits
                pl.BlockSpec((1, cp), lambda i: (0, 0)),         # class weights
            ],
            out_specs=pl.BlockSpec((block_b, 1), lambda i: (i, 0)),
        ),
        compiler_params=pltpu.CompilerParams(
            dimension_semantics=("parallel",)),
        cost_estimate=cost,
    )(labels, logits, w_row)

    loss = out[:B]                            # (B, 1) per-row losses
    if reduction == 'sum':
        return jnp.sum(loss)
    elif reduction == 'mean':
        return jnp.mean(loss)
    return loss


def _ce_loss_ref(logits, target_idx, class_weights, *, temperature,
                 label_smoothing):
    """Pure-JAX reference mirroring the torch module (keep_sum=True, sum)."""
    B, C = logits.shape
    t = jax.nn.one_hot(target_idx, C, dtype=jnp.float32)
    s = jnp.sum(t, axis=1)
    bias = s * label_smoothing / (C - s)
    slope = 1.0 - label_smoothing - bias
    t = slope[:, None] * t + bias[:, None]
    logp = jax.nn.log_softmax(logits.astype(jnp.float32) / temperature, axis=-1)
    loss = ((-t) * logp) @ class_weights.astype(jnp.float32)       # (B, 1)
    return jnp.sum(loss)


if __name__ == "__main__":
    key = jax.random.PRNGKey(0)
    k1, k2, k3, k4 = jax.random.split(key, 4)

    temperature = 2.0
    label_smoothing = 0.05

    # ---- test 1: aligned-ish small shape, f32 ----
    batch, n_classes = 8, 16
    logits = jax.random.normal(k1, (batch, n_classes), dtype=jnp.float32)
    labels = jax.random.randint(k2, (batch,), 0, n_classes, dtype=jnp.int32)
    class_weights = (0.5 + jnp.arange(n_classes, dtype=jnp.float32)
                     / n_classes).reshape(n_classes, 1)

    out = ce_loss(logits, labels, class_weights, temperature=temperature,
                  label_smoothing=label_smoothing, n_classes=n_classes)
    out = jax.block_until_ready(out)
    ref = _ce_loss_ref(logits, labels, class_weights, temperature=temperature,
                       label_smoothing=label_smoothing)
    assert jnp.allclose(out, ref, rtol=1e-5, atol=1e-4), (out, ref)

    # ---- test 2: unaligned shape exercises row/column padding + masking ----
    b2, c2 = 13, 37
    logits2 = jax.random.normal(k3, (b2, c2), dtype=jnp.float32)
    labels2 = jax.random.randint(k4, (b2,), 0, c2, dtype=jnp.int32)
    w2 = (0.25 + jnp.arange(c2, dtype=jnp.float32) / c2).reshape(c2, 1)
    out2 = jax.block_until_ready(
        ce_loss(logits2, labels2, w2, temperature=temperature,
                label_smoothing=label_smoothing, n_classes=c2))
    ref2 = _ce_loss_ref(logits2, labels2, w2, temperature=temperature,
                        label_smoothing=label_smoothing)
    assert jnp.allclose(out2, ref2, rtol=1e-5, atol=1e-4), (out2, ref2)

    # ---- test 3: bf16 ingress (logits stay bf16 on the wire, f32 in-kernel) ----
    logits_bf16 = logits.astype(jnp.bfloat16)
    out3 = jax.block_until_ready(
        ce_loss(logits_bf16, labels, class_weights, temperature=temperature,
                label_smoothing=label_smoothing, n_classes=n_classes))
    ref3 = _ce_loss_ref(logits_bf16.astype(jnp.float32), labels, class_weights,
                        temperature=temperature, label_smoothing=label_smoothing)
    assert jnp.allclose(out3, ref3, rtol=1e-4, atol=1e-3), (out3, ref3)

    print("KERNEL_OK")
</pallas_src>

<mosaic_0001>
module attributes {stable_mosaic.version = 11 : i64} {
  func.func @_celoss_kernel(%arg0: i32, %arg1: memref<512x1xi32, #tpu.memory_space<vmem>>, %arg2: memref<512x128xf32, #tpu.memory_space<vmem>>, %arg3: memref<1x128xf32, #tpu.memory_space<vmem>>, %arg4: memref<512x1xf32, #tpu.memory_space<vmem>>) attributes {dimension_semantics = [#tpu.dimension_semantics<parallel>], iteration_bounds = array<i64: 1>, scalar_prefetch = 0 : i64, scratch_operands = 0 : i64, tpu.core_type = #tpu.core_type<tc>, window_params = [{transform_indices = @transform_0, window_bounds = array<i64: 512, 1>}, {transform_indices = @transform_1, window_bounds = array<i64: 512, 128>}, {pipeline_mode = #tpu.pipeline_mode<synchronous>, transform_indices = @transform_2, window_bounds = array<i64: 1, 128>}, {transform_indices = @transform_3, window_bounds = array<i64: 512, 1>}]} {
    %c0 = arith.constant 0 : index
    %c0_0 = arith.constant 0 : index
    %0 = vector.load %arg2[%c0, %c0_0] : memref<512x128xf32, #tpu.memory_space<vmem>>, vector<512x128xf32>
    %c0_1 = arith.constant 0 : index
    %c0_2 = arith.constant 0 : index
    %1 = vector.load %arg3[%c0_1, %c0_2] : memref<1x128xf32, #tpu.memory_space<vmem>>, vector<1x128xf32>
    %c0_3 = arith.constant 0 : index
    %c0_4 = arith.constant 0 : index
    %2 = vector.load %arg1[%c0_3, %c0_4] : memref<512x1xi32, #tpu.memory_space<vmem>>, vector<512x1xi32>
    %cst = arith.constant 5.000000e-01 : f32
    %3 = vector.broadcast %cst : f32 to vector<512x128xf32>
    %4 = arith.mulf %0, %3 : vector<512x128xf32>
    %cst_5 = arith.constant dense<0xFF800000> : vector<512xf32>
    %5 = vector.multi_reduction <maximumf>, %4, %cst_5 [1] : vector<512x128xf32> to vector<512xf32>
    %6 = vector.shape_cast %5 : vector<512xf32> to vector<512x1xf32>
    %7 = vector.broadcast %6 : vector<512x1xf32> to vector<512x128xf32>
    %8 = arith.subf %4, %7 : vector<512x128xf32>
    %9 = math.exp %8 : vector<512x128xf32>
    %cst_6 = arith.constant dense<0.000000e+00> : vector<512xf32>
    %10 = vector.multi_reduction <add>, %9, %cst_6 [1] : vector<512x128xf32> to vector<512xf32>
    %11 = vector.shape_cast %10 : vector<512xf32> to vector<512x1xf32>
    %12 = math.log %11 : vector<512x1xf32>
    %13 = arith.addf %12, %6 : vector<512x1xf32>
    %14 = vector.broadcast %13 : vector<512x1xf32> to vector<512x128xf32>
    %15 = arith.subf %4, %14 : vector<512x128xf32>
    %16 = vector.broadcast %1 : vector<1x128xf32> to vector<512x128xf32>
    %17 = arith.mulf %15, %16 : vector<512x128xf32>
    %cst_7 = arith.constant dense<0.000000e+00> : vector<512xf32>
    %18 = vector.multi_reduction <add>, %17, %cst_7 [1] : vector<512x128xf32> to vector<512xf32>
    %19 = vector.shape_cast %18 : vector<512xf32> to vector<512x1xf32>
    %20 = tpu.iota {dimensions = array<i32: 1>} : vector<512x128xi32>
    %21 = vector.broadcast %2 : vector<512x1xi32> to vector<512x128xi32>
    %22 = arith.cmpi eq, %20, %21 : vector<512x128xi32>
    %cst_8 = arith.constant 0.000000e+00 : f32
    %23 = vector.broadcast %cst_8 : f32 to vector<512x128xf32>
    %24 = arith.select %22, %17, %23 : vector<512x128xi1>, vector<512x128xf32>
    %cst_9 = arith.constant dense<0.000000e+00> : vector<512xf32>
    %25 = vector.multi_reduction <add>, %24, %cst_9 [1] : vector<512x128xf32> to vector<512xf32>
    %26 = vector.shape_cast %25 : vector<512xf32> to vector<512x1xf32>
    %cst_10 = arith.constant 0.946666657 : f32
    %27 = vector.broadcast %cst_10 : f32 to vector<512x1xf32>
    %28 = arith.mulf %27, %26 : vector<512x1xf32>
    %cst_11 = arith.constant 0.00333333341 : f32
    %29 = vector.broadcast %cst_11 : f32 to vector<512x1xf32>
    %30 = arith.mulf %29, %19 : vector<512x1xf32>
    %31 = arith.addf %28, %30 : vector<512x1xf32>
    %cst_12 = arith.constant 0.000000e+00 : f32
    %32 = vector.broadcast %cst_12 : f32 to vector<512x1xf32>
    %33 = arith.subf %32, %31 : vector<512x1xf32>
    %c512_i32 = arith.constant 512 : i32
    %34 = arith.muli %arg0, %c512_i32 : i32
    %35 = tpu.iota {dimensions = array<i32: 0>} : vector<512x1xi32>
    %36 = vector.broadcast %34 : i32 to vector<512x1xi32>
    %37 = arith.addi %36, %35 : vector<512x1xi32>
    %c8_i32 = arith.constant 8 : i32
    %38 = vector.broadcast %c8_i32 : i32 to vector<512x1xi32>
    %39 = arith.cmpi slt, %37, %38 : vector<512x1xi32>
    %cst_13 = arith.constant 0.000000e+00 : f32
    %40 = vector.broadcast %cst_13 : f32 to vector<512x1xf32>
    %41 = arith.select %39, %33, %40 : vector<512x1xi1>, vector<512x1xf32>
    %c0_14 = arith.constant 0 : index
    %c0_15 = arith.constant 0 : index
    %42 = vector.load %arg4[%c0_14, %c0_15] : memref<512x1xf32, #tpu.memory_space<vmem>>, vector<512x1xf32>
    tpu.vector_store %arg4[%c0_14, %c0_15], %41 {strides = array<i32>} : memref<512x1xf32, #tpu.memory_space<vmem>>, vector<512x1xf32>,
    return
  }
  func.func @transform_0(%arg0: i32) -> (i32, i32) {
    %c0_i32 = arith.constant 0 : i32
    %c0_i32_0 = arith.constant 0 : i32
    return %arg0, %c0_i32 : i32, i32
  }
  func.func @transform_1(%arg0: i32) -> (i32, i32) {
    %c0_i32 = arith.constant 0 : i32
    %c0_i32_0 = arith.constant 0 : i32
    return %arg0, %c0_i32 : i32, i32
  }
  func.func @transform_2(%arg0: i32) -> (i32, i32) {
    %c0_i32 = arith.constant 0 : i32
    %c0_i32_0 = arith.constant 0 : i32
    %c0_i32_1 = arith.constant 0 : i32
    return %c0_i32, %c0_i32_0 : i32, i32
  }
  func.func @transform_3(%arg0: i32) -> (i32, i32) {
    %c0_i32 = arith.constant 0 : i32
    %c0_i32_0 = arith.constant 0 : i32
    return %arg0, %c0_i32 : i32, i32
  }
}

</mosaic_0001>

<bundles_post_ra>
// kernel: tpu_custom_call.1
= control target key start
LH: loop header
LB: loop body
LE: loop exit
PB: predicated region body
PF: predicated region fallthrough
CT: control target
= control target key end

     0   :  { %v2149_v3 = vmov 0   ;;  %v1106_v9 = vlaneseq  ;;  %vm2071_vm1 = vcmask 7168   ;;  %v2150_v19 = vmov 0.0   ;;  %s2499_s1 = inlined_call_operand.vmem [shape: f32[512,128], index: 1, kind: input, shape index: {}]   ;;  %s2500_s0 = inlined_call_operand.vmem [shape: s32[512,1], index: 0, kind: input, shape index: {}]   ;;  %s2501_s2 = inlined_call_operand.vmem [shape: f32[1,128], index: 2, kind: input, shape index: {}]   ;;  %s2502_s3 = inlined_call_operand.vmem [shape: f32[512,1], index: 3, kind: output, shape index: {}]  }
   0x1   :  { %v14_v0 = vld [vmem:[%s2499_s1] sm:$0xff]  ;;  %2142 = vset.pattern.permute.xlu1 %v2149_v3  ;;  %2143 = vset.pattern.permute.xlu0 %v2149_v3  ;;  %2073 = vst.msk [vmem:[%s2502_s3 + $0x8] sm:$0xff] %vm2071_vm1, %v2150_v19 }
   0x2   :  { %v143_v1 = vmul.f32 0.5, %v14_v0  ;;  %v79_v2 = vld [vmem:[%s2500_s0] sm:$0xff]  ;;  %v1107_v12 = vand.u32 127, %v1106_v9  ;;  %2074 = vst.msk [vmem:[%s2502_s3 + $0x10] sm:$0xff] %vm2071_vm1, %v2150_v19 }
   0x3   :  { %1109 = vperm.xlu1 %2142, %v79_v2   ;;  %v2144_v15 = vld [vmem:[%s2501_s2] ss:$0 sm:$0xff]  ;;  %2075 = vst.msk [vmem:[%s2502_s3 + $0x18] sm:$0xff] %vm2071_vm1, %v2150_v19 }
   0x4   :  { %207 = vmax.xlane.f32.xlu0 %v143_v1  ;;  %2076 = vst.msk [vmem:[%s2502_s3 + $0x20] sm:$0xff] %vm2071_vm1, %v2150_v19 }
   0x5   :  { %2077 = vst.msk [vmem:[%s2502_s3 + $0x28] sm:$0xff] %vm2071_vm1, %v2150_v19 }
   0x6   :  { %2078 = vst.msk [vmem:[%s2502_s3 + $0x30] sm:$0xff] %vm2071_vm1, %v2150_v19 }
   0x7   :  { %2079 = vst.msk [vmem:[%s2502_s3 + $0x38] sm:$0xff] %vm2071_vm1, %v2150_v19 }
   0x8   :  { %2080 = vst.msk [vmem:[%s2502_s3 + $0x40] sm:$0xff] %vm2071_vm1, %v2150_v19 }
   0x9   :  { %2081 = vst.msk [vmem:[%s2502_s3 + $0x48] sm:$0xff] %vm2071_vm1, %v2150_v19 }
   0xa   :  { %2082 = vst.msk [vmem:[%s2502_s3 + $0x50] sm:$0xff] %vm2071_vm1, %v2150_v19 }
   0xb   :  { %2083 = vst.msk [vmem:[%s2502_s3 + $0x58] sm:$0xff] %vm2071_vm1, %v2150_v19 }
   0xc   :  { %2084 = vst.msk [vmem:[%s2502_s3 + $0x60] sm:$0xff] %vm2071_vm1, %v2150_v19 }
   0xd   :  { %2085 = vst.msk [vmem:[%s2502_s3 + $0x68] sm:$0xff] %vm2071_vm1, %v2150_v19 }
   0xe   :  { %2086 = vst.msk [vmem:[%s2502_s3 + $0x70] sm:$0xff] %vm2071_vm1, %v2150_v19 }
   0xf   :  { %2087 = vst.msk [vmem:[%s2502_s3 + $0x78] sm:$0xff] %vm2071_vm1, %v2150_v19 }
  0x10   :  { %2088 = vst.msk [vmem:[%s2502_s3 + $0x80] sm:$0xff] %vm2071_vm1, %v2150_v19 }
  0x11   :  { %2089 = vst.msk [vmem:[%s2502_s3 + $0x88] sm:$0xff] %vm2071_vm1, %v2150_v19 }
  0x12   :  { %2090 = vst.msk [vmem:[%s2502_s3 + $0x90] sm:$0xff] %vm2071_vm1, %v2150_v19 }
  0x13   :  { %2091 = vst.msk [vmem:[%s2502_s3 + $0x98] sm:$0xff] %vm2071_vm1, %v2150_v19 }
  0x14   :  { %2092 = vst.msk [vmem:[%s2502_s3 + $0xa0] sm:$0xff] %vm2071_vm1, %v2150_v19 }
  0x15   :  { %2093 = vst.msk [vmem:[%s2502_s3 + $0xa8] sm:$0xff] %vm2071_vm1, %v2150_v19 }
  0x16   :  { %2094 = vst.msk [vmem:[%s2502_s3 + $0xb0] sm:$0xff] %vm2071_vm1, %v2150_v19 }
  0x17   :  { %2095 = vst.msk [vmem:[%s2502_s3 + $0xb8] sm:$0xff] %vm2071_vm1, %v2150_v19 }
  0x18   :  { %2096 = vst.msk [vmem:[%s2502_s3 + $0xc0] sm:$0xff] %vm2071_vm1, %v2150_v19 }
  0x19   :  { %2097 = vst.msk [vmem:[%s2502_s3 + $0xc8] sm:$0xff] %vm2071_vm1, %v2150_v19 }
  0x1a   :  { %2098 = vst.msk [vmem:[%s2502_s3 + $0xd0] sm:$0xff] %vm2071_vm1, %v2150_v19 }
  0x1b   :  { %2099 = vst.msk [vmem:[%s2502_s3 + $0xd8] sm:$0xff] %vm2071_vm1, %v2150_v19 }
  0x1c   :  { %2100 = vst.msk [vmem:[%s2502_s3 + $0xe0] sm:$0xff] %vm2071_vm1, %v2150_v19 }
  0x1d   :  { %2101 = vst.msk [vmem:[%s2502_s3 + $0xe8] sm:$0xff] %vm2071_vm1, %v2150_v19 }
  0x1e   :  { %2102 = vst.msk [vmem:[%s2502_s3 + $0xf0] sm:$0xff] %vm2071_vm1, %v2150_v19 }
  0x1f   :  { %2103 = vst.msk [vmem:[%s2502_s3 + $0xf8] sm:$0xff] %vm2071_vm1, %v2150_v19 }
  0x20   :  { %2104 = vst.msk [vmem:[%s2502_s3 + $0x100] sm:$0xff] %vm2071_vm1, %v2150_v19 }
  0x21   :  { %2105 = vst.msk [vmem:[%s2502_s3 + $0x108] sm:$0xff] %vm2071_vm1, %v2150_v19 }
  0x22   :  { %2106 = vst.msk [vmem:[%s2502_s3 + $0x110] sm:$0xff] %vm2071_vm1, %v2150_v19 }
  0x23   :  { %2107 = vst.msk [vmem:[%s2502_s3 + $0x118] sm:$0xff] %vm2071_vm1, %v2150_v19 }
  0x24   :  { %2108 = vst.msk [vmem:[%s2502_s3 + $0x120] sm:$0xff] %vm2071_vm1, %v2150_v19 }
  0x25   :  { %2109 = vst.msk [vmem:[%s2502_s3 + $0x128] sm:$0xff] %vm2071_vm1, %v2150_v19 }
  0x26   :  { %2110 = vst.msk [vmem:[%s2502_s3 + $0x130] sm:$0xff] %vm2071_vm1, %v2150_v19 }
  0x27   :  { %2111 = vst.msk [vmem:[%s2502_s3 + $0x138] sm:$0xff] %vm2071_vm1, %v2150_v19 }
  0x28   :  { %2112 = vst.msk [vmem:[%s2502_s3 + $0x140] sm:$0xff] %vm2071_vm1, %v2150_v19 }
  0x29   :  { %2113 = vst.msk [vmem:[%s2502_s3 + $0x148] sm:$0xff] %vm2071_vm1, %v2150_v19 }
  0x2a   :  { %2114 = vst.msk [vmem:[%s2502_s3 + $0x150] sm:$0xff] %vm2071_vm1, %v2150_v19 }
  0x2b   :  { %2115 = vst.msk [vmem:[%s2502_s3 + $0x158] sm:$0xff] %vm2071_vm1, %v2150_v19 }
  0x2c   :  { %2116 = vst.msk [vmem:[%s2502_s3 + $0x160] sm:$0xff] %vm2071_vm1, %v2150_v19 }
  0x2d   :  { %2117 = vst.msk [vmem:[%s2502_s3 + $0x168] sm:$0xff] %vm2071_vm1, %v2150_v19 }
  0x2e   :  { %2118 = vst.msk [vmem:[%s2502_s3 + $0x170] sm:$0xff] %vm2071_vm1, %v2150_v19 }
  0x2f   :  { %2119 = vst.msk [vmem:[%s2502_s3 + $0x178] sm:$0xff] %vm2071_vm1, %v2150_v19 }
  0x30   :  { %2120 = vst.msk [vmem:[%s2502_s3 + $0x180] sm:$0xff] %vm2071_vm1, %v2150_v19 }
  0x31   :  { %2121 = vst.msk [vmem:[%s2502_s3 + $0x188] sm:$0xff] %vm2071_vm1, %v2150_v19 }
  0x32   :  { %2122 = vst.msk [vmem:[%s2502_s3 + $0x190] sm:$0xff] %vm2071_vm1, %v2150_v19 }
  0x33   :  { %2123 = vst.msk [vmem:[%s2502_s3 + $0x198] sm:$0xff] %vm2071_vm1, %v2150_v19 }
  0x34   :  { %2124 = vst.msk [vmem:[%s2502_s3 + $0x1a0] sm:$0xff] %vm2071_vm1, %v2150_v19 }
  0x35   :  { %2125 = vst.msk [vmem:[%s2502_s3 + $0x1a8] sm:$0xff] %vm2071_vm1, %v2150_v19 }
  0x36   :  { %2126 = vst.msk [vmem:[%s2502_s3 + $0x1b0] sm:$0xff] %vm2071_vm1, %v2150_v19 }
  0x37   :  { %2127 = vst.msk [vmem:[%s2502_s3 + $0x1b8] sm:$0xff] %vm2071_vm1, %v2150_v19 }
  0x38   :  { %2128 = vst.msk [vmem:[%s2502_s3 + $0x1c0] sm:$0xff] %vm2071_vm1, %v2150_v19 }
  0x39   :  { %2129 = vst.msk [vmem:[%s2502_s3 + $0x1c8] sm:$0xff] %vm2071_vm1, %v2150_v19 }
  0x3a   :  { %2130 = vst.msk [vmem:[%s2502_s3 + $0x1d0] sm:$0xff] %vm2071_vm1, %v2150_v19 }
  0x3b   :  { %2131 = vst.msk [vmem:[%s2502_s3 + $0x1d8] sm:$0xff] %vm2071_vm1, %v2150_v19 }
  0x3c   :  { %2132 = vst.msk [vmem:[%s2502_s3 + $0x1e0] sm:$0xff] %vm2071_vm1, %v2150_v19 }
  0x3d   :  { %2133 = vst.msk [vmem:[%s2502_s3 + $0x1e8] sm:$0xff] %vm2071_vm1, %v2150_v19 }
  0x3e   :  { %2134 = vst.msk [vmem:[%s2502_s3 + $0x1f0] sm:$0xff] %vm2071_vm1, %v2150_v19 }
  0x3f   :  { %2135 = vst.msk [vmem:[%s2502_s3 + $0x1f8] sm:$0xff] %vm2071_vm1, %v2150_v19 }
  0x75   :  { %v1110_v14 = vpop.permute.xlu1 %1109 }
  0x76   :  { %vm1300_vm0 = vcmp.eq.s32.totalorder %v1107_v12, %v1110_v14 }
  0x77   :  { %v208_v4 = vpop.xlane.xlu0 %207 }
  0x78   :  { %v335_v5 = vsub.f32 %v143_v1, %v208_v4 }
  0x7a   :  { %v399_v6 = vmul.f32 1.442695, %v335_v5 }
  0x7c   :  { %2145 = vpow2.f32 %v399_v6 }
  0x82   :  { %v2146_v7 = vpop.eup %2145 }
  0x83   :  { %527 = vadd.xlane.f32.xlu0 %v2146_v7 }
  0xf6   :  { %v528_v8 = vpop.xlane.xlu0 %527 }
  0xf7   :  { %2147 = vlog2.f32 %v528_v8 }
  0xfd   :  { %v2148_v10 = vpop.eup %2147 }
  0xfe   :  { %v656_v11 = vmul.f32 0.6931472, %v2148_v10 }
 0x100   :  { %v783_v13 = vadd.f32 %v656_v11, %v208_v4 }
 0x102   :  { %v847_v16 = vsub.f32 %v143_v1, %v783_v13 }
 0x104   :  { %v914_v17 = vmul.f32 %v2144_v15, %v847_v16 }
 0x106   :  { %978 = vadd.xlane.f32.xlu1 %v914_v17  ;;  %v1364_v18 = vsel %vm1300_vm0, %v914_v17, 0.0 }
 0x107   :  { %1428 = vadd.xlane.f32.xlu2 %v1364_v18 }
 0x179   :  { %v979_v20 = vpop.xlane.xlu1 %978 }
 0x17a   :  { %v1429_v21 = vpop.xlane.xlu2 %1428  ;;  %v1620_v22 = vmul.f32 0.0033333334, %v979_v20 }
 0x17b   :  { %v1556_v23 = vmul.f32 0.94666666, %v1429_v21 }
 0x17d   :  { %v1684_v24 = vadd.f32 %v1620_v22, %v1556_v23 }
 0x17f   :  { %v1748_v25 = vsub.f32 0.0, %v1684_v24 }
 0x181   :  { %2072 = vst.msk [vmem:[%s2502_s3] sm:$0xff] %vm2071_vm1, %v1748_v25 }

</bundles_post_ra>
